<compile_context>
chip_gen: v5e
topology: v5e:2x2
jax: 0.10.0
libtpu: 0.0.40
codegen_flags: <defaults>
</compile_context>

<pallas_src>
import functools

import jax
import jax.numpy as jnp
from jax import lax
from jax.experimental import pallas as pl
from jax.experimental.pallas import tpu as pltpu


_MIN_GRID_STEPS = 4  # >= 2x TensorCores on v7x; keeps pipeline + megacore busy


def _round_up(x, m):
    return ((x + m - 1) // m) * m


def _sublane_multiple(itemsize):
    # 32-bit -> 8 sublanes, bf16 -> 16, int8/fp8 -> 32 (sublane packing).
    return 8 * max(1, 4 // max(1, itemsize))


@functools.lru_cache(maxsize=None)
def _budgets():
    """(block_budget_elems_f32equiv, vmem_limit_bytes) for this TPU generation."""
    vmem_bytes = None
    try:
        vmem_bytes = pltpu.get_tpu_info().vmem_capacity_bytes
    except Exception:
        vmem_bytes = None
    if vmem_bytes is not None and vmem_bytes >= 100 * 1024 * 1024:
        # v5e / v6e: 128 MiB VMEM -> big streaming tiles near the HBM roofline.
        return (6 * 1024 * 1024) // 4, 48 * 1024 * 1024
    # v7x (64 MiB / TC) or unknown: smaller blocks so double-buffered I/O plus
    # the in-kernel f32 temporaries leave compiler-scratch headroom.  Streaming
    # rooflines already saturate by ~0.5-1 MiB blocks, so this costs nothing.
    return (2 * 1024 * 1024) // 4, 30 * 1024 * 1024


# ----------------------------- kernels --------------------------------------


def _ln_rows_kernel(x_ref, w_ref, b_ref, o_ref, *, eps):
    # x_ref: (tile_rows, C); normalize each row over the lane (C) axis.
    x = x_ref[...].astype(jnp.float32)
    u = jnp.mean(x, axis=-1, keepdims=True)
    xc = x - u  # x is dead past this point -> single full-size f32 temp
    s = jnp.mean(xc * xc, axis=-1, keepdims=True)
    inv = lax.rsqrt(s + eps)
    o_ref[...] = (xc * inv * w_ref[...] + b_ref[...]).astype(o_ref.dtype)


def _ln_packed_rows_kernel(x_ref, w_ref, b_ref, o_ref, *, eps, c):
    # Lane-dense path for C < 128 (128 % C == 0): each vreg row holds
    # k = width // C logical rows.  Per-segment sums go through the MXU via a
    # block-diagonal ones matrix (result is already broadcast back over the
    # segment), keeping stores full-lane and the VPU/XLU free.
    x = x_ref[...].astype(jnp.float32)  # (tile, width)
    width = x.shape[-1]
    row = lax.broadcasted_iota(jnp.int32, (width, width), 0) // c
    col = lax.broadcasted_iota(jnp.int32, (width, width), 1) // c
    seg = (row == col).astype(jnp.float32)  # (width, width) block-diag ones
    inv_c = 1.0 / float(c)
    u = jnp.dot(x, seg, preferred_element_type=jnp.float32,
                precision=lax.Precision.HIGHEST) * inv_c
    xc = x - u
    s = jnp.dot(xc * xc, seg, preferred_element_type=jnp.float32,
                precision=lax.Precision.HIGHEST) * inv_c
    inv = lax.rsqrt(s + eps)
    o_ref[...] = (xc * inv * w_ref[...] + b_ref[...]).astype(o_ref.dtype)


def _ln_cf_kernel(x_ref, w_ref, b_ref, o_ref, *, eps):
    # channels_first: x_ref (tile_n, C, tile_hw); reduce over C (axis=1).
    x = x_ref[...].astype(jnp.float32)
    u = jnp.mean(x, axis=1, keepdims=True)
    xc = x - u
    s = jnp.mean(xc * xc, axis=1, keepdims=True)
    inv = lax.rsqrt(s + eps)
    o_ref[...] = (xc * inv * w_ref[...] + b_ref[...]).astype(o_ref.dtype)


# ----------------------------- tiling helpers --------------------------------


def _pick_tile_rows(rows, width, itemsize, budget_elems):
    sub = _sublane_multiple(itemsize)
    tile = max(sub, (budget_elems // max(width, 1)) // sub * sub)
    if rows > _MIN_GRID_STEPS * sub:
        # Keep >= ~4 grid steps: pipeline overlap + megacore sharding.
        tile = min(tile, max(sub, _round_up(-(-rows // _MIN_GRID_STEPS), sub)))
    return min(tile, max(sub, _round_up(rows, sub)))


# ----------------------------- wrappers ---------------------------------------


def _layernorm_channels_last(x2d, weight, bias, eps):
    """LayerNorm over the last dim of a 2-D (rows, C) array."""
    rows, c = x2d.shape
    budget_elems, vmem_limit = _budgets()
    itemsize = x2d.dtype.itemsize

    # Lane-dense repack: for C < 128 with 128 % C == 0, view (rows, C) as
    # (rows/k, 128) -- free contiguous reshape -> unmasked full-lane stores.
    k = 128 // c if (c < 128 and 128 % c == 0) else 1
    if k > 1 and rows % k == 0:
        xk = x2d.reshape(rows // k, c * k)
        wk = jnp.tile(weight.astype(jnp.float32), k).reshape(1, c * k)
        bk = jnp.tile(bias.astype(jnp.float32), k).reshape(1, c * k)
        kernel = functools.partial(_ln_packed_rows_kernel, eps=eps, c=c)
    else:
        k = 1
        xk = x2d
        wk = weight.reshape(1, c).astype(jnp.float32)
        bk = bias.reshape(1, c).astype(jnp.float32)
        kernel = functools.partial(_ln_rows_kernel, eps=eps)

    prows, width = xk.shape
    tile = _pick_tile_rows(prows, width, itemsize, budget_elems)
    grid = (pl.cdiv(prows, tile),)

    out = pl.pallas_call(
        kernel,
        out_shape=jax.ShapeDtypeStruct((prows, width), x2d.dtype),
        grid=grid,
        in_specs=[
            pl.BlockSpec((tile, width), lambda i: (i, 0)),
            pl.BlockSpec((1, width), lambda i: (0, 0)),
            pl.BlockSpec((1, width), lambda i: (0, 0)),
        ],
        out_specs=pl.BlockSpec((tile, width), lambda i: (i, 0)),
        compiler_params=pltpu.CompilerParams(
            dimension_semantics=("parallel",),
            vmem_limit_bytes=vmem_limit,
        ),
    )(xk, wk, bk)
    return out.reshape(rows, c)


def _layernorm_channels_first(x3d, weight, bias, eps):
    """LayerNorm over axis 1 (C) of a (N, C, HW) array — transpose-free."""
    n, c, hw = x3d.shape
    budget_elems, vmem_limit = _budgets()

    # Lane tile over flattened H*W: full extent if it fits, else 128-multiples.
    if c * hw <= budget_elems or hw <= 128:
        tile_hw = hw
    else:
        tile_hw = max(128, (budget_elems // max(c, 1)) // 128 * 128)

    # Pack several images per block so small C doesn't pay per-step overhead;
    # keep >= ~4 grid steps along N when there is enough data.
    tile_n = max(1, min(n, budget_elems // max(c * tile_hw, 1)))
    if n > _MIN_GRID_STEPS:
        tile_n = min(tile_n, max(1, -(-n // _MIN_GRID_STEPS)))

    grid = (pl.cdiv(n, tile_n), pl.cdiv(hw, tile_hw))
    w3 = weight.reshape(1, c, 1).astype(jnp.float32)
    b3 = bias.reshape(1, c, 1).astype(jnp.float32)

    return pl.pallas_call(
        functools.partial(_ln_cf_kernel, eps=eps),
        out_shape=jax.ShapeDtypeStruct((n, c, hw), x3d.dtype),
        grid=grid,
        in_specs=[
            pl.BlockSpec((tile_n, c, tile_hw), lambda i, j: (i, 0, j)),
            pl.BlockSpec((1, c, 1), lambda i, j: (0, 0, 0)),
            pl.BlockSpec((1, c, 1), lambda i, j: (0, 0, 0)),
        ],
        out_specs=pl.BlockSpec((tile_n, c, tile_hw), lambda i, j: (i, 0, j)),
        compiler_params=pltpu.CompilerParams(
            dimension_semantics=("parallel", "parallel"),
            vmem_limit_bytes=vmem_limit,
        ),
    )(x3d, w3, b3)


class LayerNormPallas:
    """Mirrors the PyTorch LayerNorm module (forward pass only)."""

    def __init__(self, normalized_shape, eps=1e-6, data_format="channels_last"):
        if data_format not in ("channels_last", "channels_first"):
            raise NotImplementedError
        self.weight = jnp.ones((normalized_shape,), dtype=jnp.float32)
        self.bias = jnp.zeros((normalized_shape,), dtype=jnp.float32)
        self.eps = eps
        self.data_format = data_format
        self.normalized_shape = normalized_shape

    def __call__(self, x):
        c = self.normalized_shape
        if self.data_format == "channels_last":
            orig_shape = x.shape
            assert orig_shape[-1] == c
            out = _layernorm_channels_last(
                x.reshape(-1, c), self.weight, self.bias, self.eps
            )
            return out.reshape(orig_shape)
        else:
            orig_shape = x.shape
            assert orig_shape[1] == c
            n = orig_shape[0]
            hw = 1
            for d in orig_shape[2:]:
                hw *= d
            x3d = x.reshape(n, c, hw)  # free reshape, no transpose
            out = _layernorm_channels_first(x3d, self.weight, self.bias, self.eps)
            return out.reshape(orig_shape)


# ----------------------------- references & test ------------------------------


def _ref_channels_last(x, w, b, eps):
    u = jnp.mean(x, axis=-1, keepdims=True)
    s = jnp.mean((x - u) ** 2, axis=-1, keepdims=True)
    return (x - u) / jnp.sqrt(s + eps) * w + b


def _ref_channels_first(x, w, b, eps):
    u = jnp.mean(x, axis=1, keepdims=True)
    s = jnp.mean((x - u) ** 2, axis=1, keepdims=True)
    xn = (x - u) / jnp.sqrt(s + eps)
    return w[None, :, None, None] * xn + b[None, :, None, None]


if __name__ == "__main__":
    key = jax.random.PRNGKey(0)
    k1, k2, k3, kw1, kb1, kw2, kb2, kw3, kb3 = jax.random.split(key, 9)

    # channels_first: NCHW, normalize over C (transpose-free, N-tiled blocks)
    x_cf = jax.random.normal(k1, (2, 4, 16, 16), dtype=jnp.float32)
    ln_cf = LayerNormPallas(4, eps=1e-6, data_format="channels_first")
    ln_cf.weight = jax.random.normal(kw1, (4,), dtype=jnp.float32)
    ln_cf.bias = jax.random.normal(kb1, (4,), dtype=jnp.float32)
    y_cf = ln_cf(x_cf)
    jax.block_until_ready(y_cf)
    ref_cf = _ref_channels_first(x_cf, ln_cf.weight, ln_cf.bias, 1e-6)
    assert jnp.max(jnp.abs(y_cf - ref_cf)) < 1e-4

    # channels_last: NHWC, C=32 -> lane-dense packed path (MXU segment sums)
    x_cl = jax.random.normal(k2, (2, 16, 16, 32), dtype=jnp.float32)
    ln_cl = LayerNormPallas(32, eps=1e-6, data_format="channels_last")
    ln_cl.weight = jax.random.normal(kw2, (32,), dtype=jnp.float32)
    ln_cl.bias = jax.random.normal(kb2, (32,), dtype=jnp.float32)
    y_cl = ln_cl(x_cl)
    jax.block_until_ready(y_cl)
    ref_cl = _ref_channels_last(x_cl, ln_cl.weight, ln_cl.bias, 1e-6)
    assert jnp.max(jnp.abs(y_cl - ref_cl)) < 1e-4

    # channels_last fallback: C=48 does not divide 128 -> standard row kernel
    x_fb = jax.random.normal(k3, (2, 8, 8, 48), dtype=jnp.float32)
    ln_fb = LayerNormPallas(48, eps=1e-6, data_format="channels_last")
    ln_fb.weight = jax.random.normal(kw3, (48,), dtype=jnp.float32)
    ln_fb.bias = jax.random.normal(kb3, (48,), dtype=jnp.float32)
    y_fb = ln_fb(x_fb)
    jax.block_until_ready(y_fb)
    ref_fb = _ref_channels_last(x_fb, ln_fb.weight, ln_fb.bias, 1e-6)
    assert jnp.max(jnp.abs(y_fb - ref_fb)) < 1e-4

    print("KERNEL_OK")
</pallas_src>

<mosaic_0001>
module attributes {stable_mosaic.version = 11 : i64} {
  func.func @_ln_cf_kernel(%arg0: i32, %arg1: i32, %arg2: memref<2x4x256xf32, #tpu.memory_space<vmem>>, %arg3: memref<1x4x1xf32, #tpu.memory_space<vmem>>, %arg4: memref<1x4x1xf32, #tpu.memory_space<vmem>>, %arg5: memref<2x4x256xf32, #tpu.memory_space<vmem>>) attributes {dimension_semantics = [#tpu.dimension_semantics<parallel>, #tpu.dimension_semantics<parallel>], iteration_bounds = array<i64: 1, 1>, scalar_prefetch = 0 : i64, scratch_operands = 0 : i64, tpu.core_type = #tpu.core_type<tc>, window_params = [{transform_indices = @transform_0, window_bounds = array<i64: 2, 4, 256>}, {pipeline_mode = #tpu.pipeline_mode<synchronous>, transform_indices = @transform_1, window_bounds = array<i64: 1, 4, 1>}, {pipeline_mode = #tpu.pipeline_mode<synchronous>, transform_indices = @transform_2, window_bounds = array<i64: 1, 4, 1>}, {transform_indices = @transform_3, window_bounds = array<i64: 2, 4, 256>}]} {
    %c0 = arith.constant 0 : index
    %c0_0 = arith.constant 0 : index
    %c0_1 = arith.constant 0 : index
    %0 = vector.load %arg2[%c0, %c0_0, %c0_1] : memref<2x4x256xf32, #tpu.memory_space<vmem>>, vector<2x4x256xf32>
    %cst = arith.constant dense<0.000000e+00> : vector<2x256xf32>
    %1 = vector.multi_reduction <add>, %0, %cst [1] : vector<2x4x256xf32> to vector<2x256xf32>
    %2 = vector.shape_cast %1 : vector<2x256xf32> to vector<2x1x256xf32>
    %cst_2 = arith.constant 4.000000e+00 : f32
    %3 = vector.broadcast %cst_2 : f32 to vector<2x1x256xf32>
    %4 = arith.divf %2, %3 : vector<2x1x256xf32>
    %5 = vector.broadcast %4 : vector<2x1x256xf32> to vector<2x4x256xf32>
    %6 = arith.subf %0, %5 : vector<2x4x256xf32>
    %7 = arith.mulf %6, %6 : vector<2x4x256xf32>
    %cst_3 = arith.constant dense<0.000000e+00> : vector<2x256xf32>
    %8 = vector.multi_reduction <add>, %7, %cst_3 [1] : vector<2x4x256xf32> to vector<2x256xf32>
    %9 = vector.shape_cast %8 : vector<2x256xf32> to vector<2x1x256xf32>
    %cst_4 = arith.constant 4.000000e+00 : f32
    %10 = vector.broadcast %cst_4 : f32 to vector<2x1x256xf32>
    %11 = arith.divf %9, %10 : vector<2x1x256xf32>
    %cst_5 = arith.constant 9.99999997E-7 : f32
    %12 = vector.broadcast %cst_5 : f32 to vector<2x1x256xf32>
    %13 = arith.addf %11, %12 : vector<2x1x256xf32>
    %14 = math.rsqrt %13 : vector<2x1x256xf32>
    %15 = vector.broadcast %14 : vector<2x1x256xf32> to vector<2x4x256xf32>
    %16 = arith.mulf %6, %15 : vector<2x4x256xf32>
    %c0_6 = arith.constant 0 : index
    %c0_7 = arith.constant 0 : index
    %c0_8 = arith.constant 0 : index
    %17 = vector.load %arg3[%c0_6, %c0_7, %c0_8] : memref<1x4x1xf32, #tpu.memory_space<vmem>>, vector<1x4x1xf32>
    %18 = vector.broadcast %17 : vector<1x4x1xf32> to vector<2x4x256xf32>
    %19 = arith.mulf %16, %18 : vector<2x4x256xf32>
    %c0_9 = arith.constant 0 : index
    %c0_10 = arith.constant 0 : index
    %c0_11 = arith.constant 0 : index
    %20 = vector.load %arg4[%c0_9, %c0_10, %c0_11] : memref<1x4x1xf32, #tpu.memory_space<vmem>>, vector<1x4x1xf32>
    %21 = vector.broadcast %20 : vector<1x4x1xf32> to vector<2x4x256xf32>
    %22 = arith.addf %19, %21 : vector<2x4x256xf32>
    %c0_12 = arith.constant 0 : index
    %c0_13 = arith.constant 0 : index
    %c0_14 = arith.constant 0 : index
    %23 = vector.load %arg5[%c0_12, %c0_13, %c0_14] : memref<2x4x256xf32, #tpu.memory_space<vmem>>, vector<2x4x256xf32>
    tpu.vector_store %arg5[%c0_12, %c0_13, %c0_14], %22 {strides = array<i32>} : memref<2x4x256xf32, #tpu.memory_space<vmem>>, vector<2x4x256xf32>,
    return
  }
  func.func @transform_0(%arg0: i32, %arg1: i32) -> (i32, i32, i32) {
    %c0_i32 = arith.constant 0 : i32
    %c0_i32_0 = arith.constant 0 : i32
    return %arg0, %c0_i32, %arg1 : i32, i32, i32
  }
  func.func @transform_1(%arg0: i32, %arg1: i32) -> (i32, i32, i32) {
    %c0_i32 = arith.constant 0 : i32
    %c0_i32_0 = arith.constant 0 : i32
    %c0_i32_1 = arith.constant 0 : i32
    %c0_i32_2 = arith.constant 0 : i32
    return %c0_i32, %c0_i32_0, %c0_i32_1 : i32, i32, i32
  }
  func.func @transform_2(%arg0: i32, %arg1: i32) -> (i32, i32, i32) {
    %c0_i32 = arith.constant 0 : i32
    %c0_i32_0 = arith.constant 0 : i32
    %c0_i32_1 = arith.constant 0 : i32
    %c0_i32_2 = arith.constant 0 : i32
    return %c0_i32, %c0_i32_0, %c0_i32_1 : i32, i32, i32
  }
  func.func @transform_3(%arg0: i32, %arg1: i32) -> (i32, i32, i32) {
    %c0_i32 = arith.constant 0 : i32
    %c0_i32_0 = arith.constant 0 : i32
    return %arg0, %c0_i32, %arg1 : i32, i32, i32
  }
}

</mosaic_0001>

<bundles_post_ra>
// kernel: tpu_custom_call.1
= control target key start
LH: loop header
LB: loop body
LE: loop exit
PB: predicated region body
PF: predicated region fallthrough
CT: control target
= control target key end

     0   :  { %8 = vsyncpa [#allocation3], 0  ;;  %s389_s0 = inlined_call_operand.hbm [shape: f32[2,4,256], index: 0, kind: input, shape index: {}]   ;;  %s390_s1 = inlined_call_operand.vmem [shape: f32[1,4,1], index: 1, kind: input, shape index: {}]   ;;  %s391_s2 = inlined_call_operand.vmem [shape: f32[1,4,1], index: 2, kind: input, shape index: {}]   ;;  %s392_s3 = inlined_call_operand.hbm [shape: f32[2,4,256], index: 3, kind: output, shape index: {}]  }
   0x1   :  { %9 = vsyncpa [#allocation4], 0  ;;  %s14_s14 = sshll.u32 %s389_s0, 4  ;;  %s316_s15 = smov [#allocation2]   ;;  %s15_s14 = int_to_ptr.hbm [resolvable:$true] %s14_s14 }
   0x2   :  { %s16_s16 = sshll.u32 %s316_s15, 4  ;;  %s317_s17 = smov 128   ;;  %s17_s16 = int_to_ptr.vmem [resolvable:$true] %s16_s16 }
   0x3   :  { %s318_s18 = smov 8  }
   0x4   :  { %22 = dma.hbm_to_vmem [thread:$0]  %s15_s14, 256, %s17_s16, [#allocation3], %s317_s17, %s317_s17, %s318_s18  }
   0x5   :  { %312 = dma.done.wait [#allocation3], 256  }
   0x6   :  { %313 = vsyncadd [#allocation3], 4294967040  ;;  %v319_v0 = vmov 0   ;;  %v201_v1 = vld [vmem:[%s390_s1] sm:$0xf]  ;;  %v320_v2 = vmov 4.0  }
   0x7   :  { %253 = vset.pattern.permute.xlu0 %v319_v0  ;;  %254 = vrcp.f32 %v320_v2  ;;  %v213_v3 = vld [vmem:[%s391_s2] sm:$0xf]  ;;  %v31_v4 = vld [vmem:[#allocation2] sm:$0xff]  ;;  %v32_v5 = vld [vmem:[#allocation2 + $0x8] sm:$0xff]  ;;  %vm46_vm0 = vcmask 1043456   ;;  %s322_s1 = smov [#allocation5]  }
   0x8   :  { %204 = vperm.xlu0 %253, %v201_v1   ;;  %35 = vst [vmem:[#allocation1] ss:$2 sm:$0xff] %v31_v4  ;;  %s231_s2 = sshll.u32 %s322_s1, 4  ;;  %s233_s24 = sshll.u32 %s392_s3, 4  ;;  %s232_s2 = int_to_ptr.vmem [resolvable:$true] %s231_s2  ;;  %s234_s24 = int_to_ptr.hbm [resolvable:$true] %s233_s24 }
   0x9   :  { %39 = vst [vmem:[#allocation1 + $0x10] ss:$2 sm:$0xff] %v32_v5 }
   0xd   :  { %v255_v6 = vpop.eup %254 }
   0xe   :  { %v76_v7 = vmul.f32 4.0, %v255_v6  ;;  %vm80_vm1 = vweird.f32 %v255_v6 }
   0xf   :  { %v37_v9 = vld.sshfl [vmem:[#allocation1 + $0x8] sm:$0xff pattern:$0x75316420]  ;;  %v36_v12 = vld.sshfl [vmem:[#allocation1] sm:$0xff pattern:$0x75316420] }
  0x10   :  { %216 = vperm.xlu0 %253, %v213_v3   ;;  %v77_v8 = vsub.f32 1.0, %v76_v7  ;;  %v41_v10 = vld.sshfl [vmem:[#allocation1 + $0x18] sm:$0xff pattern:$0x75316420]  ;;  %v54_v11 = vsel %vm46_vm0, %v37_v9, 0.0  ;;  %v47_v14 = vsel %vm46_vm0, %v36_v12, 0.0 }
  0x11   :  { %v40_v13 = vld.sshfl [vmem:[#allocation1 + $0x10] sm:$0xff pattern:$0x75316420]  ;;  %v55_v15 = vrot.slane %v54_v11, 4  ;;  %v68_v17 = vsel %vm46_vm0, %v41_v10, 0.0  ;;  %v48_v19 = vrot.slane %v47_v14, 4 }
  0x12   :  { %v61_v16 = vsel %vm46_vm0, %v40_v13, 0.0  ;;  %v78_v18 = vmul.f32 %v255_v6, %v77_v8  ;;  %v69_v21 = vrot.slane %v68_v17, 4 }
  0x13   :  { %v62_v20 = vrot.slane %v61_v16, 4  ;;  %v56_v22 = vadd.f32 %v55_v15, %v54_v11  ;;  %v49_v23 = vadd.f32 %v48_v19, %v47_v14 }
  0x14   :  { %v70_v25 = vadd.f32 %v69_v21, %v68_v17  ;;  %v79_v27 = vadd.f32 %v255_v6, %v78_v18 }
  0x15   :  { %v63_v24 = vadd.f32 %v62_v20, %v61_v16  ;;  %v57_v26 = vrot.slane %v56_v22, 2  ;;  %v50_v28 = vrot.slane %v49_v23, 2 }
  0x16   :  { %v71_v30 = vrot.slane %v70_v25, 2  ;;  %v81_v36 = vsel %vm80_vm1, %v255_v6, %v79_v27 }
  0x17   :  { %v64_v29 = vrot.slane %v63_v24, 2  ;;  %v58_v31 = vadd.f32 %v57_v26, %v56_v22  ;;  %v51_v32 = vadd.f32 %v50_v28, %v49_v23 }
  0x18   :  { %v72_v34 = vadd.f32 %v71_v30, %v70_v25 }
  0x19   :  { %v65_v33 = vadd.f32 %v64_v29, %v63_v24  ;;  %v59_v35 = vrot.slane %v58_v31, 1  ;;  %v52_v37 = vrot.slane %v51_v32, 1 }
  0x1a   :  { %v73_v39 = vrot.slane %v72_v34, 1 }
  0x1b   :  { %v66_v38 = vrot.slane %v65_v33, 1  ;;  %v60_v40 = vadd.f32 %v59_v35, %v58_v31  ;;  %v53_v41 = vadd.f32 %v52_v37, %v51_v32 }
  0x1c   :  { %v74_v43 = vadd.f32 %v73_v39, %v72_v34 }
  0x1d   :  { %v67_v42 = vadd.f32 %v66_v38, %v65_v33  ;;  %v83_v44 = vmul.f32 %v81_v36, %v60_v40  ;;  %v82_v45 = vmul.f32 %v81_v36, %v53_v41 }
  0x1e   :  { %v85_v47 = vmul.f32 %v81_v36, %v74_v43 }
  0x1f   :  { %v84_v46 = vmul.f32 %v81_v36, %v67_v42  ;;  %v90_v48 = vrot.slane %v83_v44, 4 }
  0x20   :  { %v91_v49 = vrot.slane %v85_v47, 4 }
  0x21   :  { %v92_v50 = vsel %vm46_vm0, %v82_v45, %v90_v48 }
  0x22   :  { %v93_v51 = vsel %vm46_vm0, %v84_v46, %v91_v49  ;;  %v361_v52 = vsub.f32 %v31_v4, %v92_v50 }
  0x23   :  { %v363_v53 = vsub.f32 %v32_v5, %v93_v51 }
  0x24   :  { %v98_v54 = vmul.f32 %v361_v52, %v361_v52 }
  0x25   :  { %v99_v55 = vmul.f32 %v363_v53, %v363_v53 }
  0x26   :  { %102 = vst [vmem:[#allocation1] ss:$2 sm:$0xff] %v98_v54 }
  0x27   :  { %106 = vst [vmem:[#allocation1 + $0x10] ss:$2 sm:$0xff] %v99_v55 }
  0x2d   :  { %v104_v56 = vld.sshfl [vmem:[#allocation1 + $0x8] sm:$0xff pattern:$0x75316420]  ;;  %v103_v57 = vld.sshfl [vmem:[#allocation1] sm:$0xff pattern:$0x75316420] }
  0x2e   :  { %v107_v58 = vld.sshfl [vmem:[#allocation1 + $0x10] sm:$0xff pattern:$0x75316420]  ;;  %v108_v59 = vld.sshfl [vmem:[#allocation1 + $0x18] sm:$0xff pattern:$0x75316420] }
  0x2f   :  { %v113_v60 = vsel %vm46_vm0, %v103_v57, 0.0  ;;  %v120_v61 = vsel %vm46_vm0, %v104_v56, 0.0  ;;  %v127_v62 = vsel %vm46_vm0, %v107_v58, 0.0  ;;  %v134_v2 = vsel %vm46_vm0, %v108_v59, 0.0 }
  0x30   :  { %v114_v63 = vrot.slane %v113_v60, 4  ;;  %v121_v0 = vrot.slane %v120_v61, 4  ;;  %v128_v1 = vrot.slane %v127_v62, 4  ;;  %v135_v3 = vrot.slane %v134_v2, 4 }
  0x32   :  { %v115_v4 = vadd.f32 %v114_v63, %v113_v60  ;;  %v122_v5 = vadd.f32 %v121_v0, %v120_v61  ;;  %v129_v6 = vadd.f32 %v128_v1, %v127_v62  ;;  %v136_v7 = vadd.f32 %v135_v3, %v134_v2 }
  0x34   :  { %v116_v8 = vrot.slane %v115_v4, 2  ;;  %v123_v9 = vrot.slane %v122_v5, 2  ;;  %v130_v10 = vrot.slane %v129_v6, 2  ;;  %v137_v11 = vrot.slane %v136_v7, 2 }
  0x36   :  { %v117_v12 = vadd.f32 %v116_v8, %v115_v4  ;;  %v124_v13 = vadd.f32 %v123_v9, %v122_v5  ;;  %v131_v14 = vadd.f32 %v130_v10, %v129_v6  ;;  %v138_v15 = vadd.f32 %v137_v11, %v136_v7 }
  0x37   :  { %v321_v5 = vmov 839922192  }
  0x38   :  { %v118_v16 = vrot.slane %v117_v12, 1  ;;  %v125_v17 = vrot.slane %v124_v13, 1  ;;  %v132_v18 = vrot.slane %v131_v14, 1  ;;  %v139_v19 = vrot.slane %v138_v15, 1 }
  0x39   :  { %v207_v6 = vunpack.c.l.s4 %v321_v5 }
  0x3a   :  { %v119_v20 = vadd.f32 %v118_v16, %v117_v12  ;;  %v126_v21 = vadd.f32 %v125_v17, %v124_v13  ;;  %v133_v22 = vadd.f32 %v132_v18, %v131_v14  ;;  %v140_v23 = vadd.f32 %v139_v19, %v138_v15 }
  0x3b   :  { %v208_v8 = vunpack.c.0.s8 %v207_v6 }
  0x3c   :  { %v141_v24 = vmul.f32 %v119_v20, %v81_v36  ;;  %v142_v25 = vmul.f32 %v126_v21, %v81_v36  ;;  %v143_v26 = vmul.f32 %v133_v22, %v81_v36  ;;  %v144_v27 = vmul.f32 %v140_v23, %v81_v36 }
  0x3e   :  { %v145_v28 = vadd.f32 1e-06, %v141_v24  ;;  %v146_v29 = vadd.f32 1e-06, %v142_v25  ;;  %v147_v30 = vadd.f32 1e-06, %v143_v26 }
  0x3f   :  { %v148_v31 = vadd.f32 1e-06, %v144_v27 }
  0x40   :  { %256 = vrsqrt.f32 %v145_v28  ;;  %vm165_vm2 = vweird.f32 %v146_v29  ;;  %vm155_vm7 = vweird.f32 %v145_v28  ;;  %vm175_vm11 = vweird.f32 %v147_v30 }
  0x41   :  { %258 = vrsqrt.f32 %v146_v29  ;;  %vm185_vm5 = vweird.f32 %v148_v31 }
  0x42   :  { %260 = vrsqrt.f32 %v147_v30 }
  0x43   :  { %262 = vrsqrt.f32 %v148_v31 }
  0x46   :  { %v257_v32 = vpop.eup %256 }
  0x47   :  { %v259_v33 = vpop.eup %258  ;;  %v150_v34 = vmul.f32 %v257_v32, %v145_v28  ;;  %vm156_vm8 = vweird.f32 %v257_v32 }
  0x48   :  { %v261_v35 = vpop.eup %260  ;;  %v160_v37 = vmul.f32 %v259_v33, %v146_v29  ;;  %vm166_vm3 = vweird.f32 %v259_v33  ;;  %vm157_vm10 = vmor %vm155_vm7, %vm156_vm8 }
  0x49   :  { %v263_v38 = vpop.eup %262  ;;  %v151_v39 = vmul.f32 %v257_v32, %v150_v34  ;;  %v170_v40 = vmul.f32 %v261_v35, %v147_v30  ;;  %vm373_vm4 = vmor %vm165_vm2, %vm166_vm3  ;;  %vm176_vm12 = vweird.f32 %v261_v35 }
  0x4a   :  { %v161_v41 = vmul.f32 %v259_v33, %v160_v37  ;;  %v180_v42 = vmul.f32 %v263_v38, %v148_v31  ;;  %vm186_vm6 = vweird.f32 %v263_v38  ;;  %vm177_vm13 = vmor %vm175_vm11, %vm176_vm12 }
  0x4b   :  { %v152_v43 = vmul.f32 0.5, %v151_v39  ;;  %v171_v36 = vmul.f32 %v261_v35, %v170_v40  ;;  %vm187_vm9 = vmor %vm185_vm5, %vm186_vm6 }
  0x4c   :  { %v162_v44 = vmul.f32 0.5, %v161_v41  ;;  %v181_v45 = vmul.f32 %v263_v38, %v180_v42 }
  0x4d   :  { %v153_v46 = vsub.f32 1.5, %v152_v43  ;;  %v172_v47 = vmul.f32 0.5, %v171_v36 }
  0x4e   :  { %v163_v48 = vsub.f32 1.5, %v162_v44  ;;  %v182_v50 = vmul.f32 0.5, %v181_v45 }
  0x4f   :  { %v154_v51 = vmul.f32 %v257_v32, %v153_v46  ;;  %v173_v54 = vsub.f32 1.5, %v172_v47 }
  0x50   :  { %v164_v55 = vmul.f32 %v259_v33, %v163_v48  ;;  %v183_v56 = vsub.f32 1.5, %v182_v50 }
  0x51   :  { %v174_v57 = vmul.f32 %v261_v35, %v173_v54  ;;  %v158_v58 = vsel %vm157_vm10, %v257_v32, %v154_v51 }
  0x52   :  { %v168_v59 = vsel %vm373_vm4, %v259_v33, %v164_v55  ;;  %v184_v60 = vmul.f32 %v263_v38, %v183_v56 }
  0x53   :  { %v193_v61 = vrot.slane %v168_v59, 4  ;;  %v178_v62 = vsel %vm177_vm13, %v261_v35, %v174_v57 }
  0x54   :  { %v188_v63 = vsel %vm187_vm9, %v263_v38, %v184_v60 }
  0x55   :  { %v194_v0 = vrot.slane %v188_v63, 4  ;;  %v195_v1 = vsel %vm46_vm0, %v158_v58, %v193_v61 }
  0x56   :  { %v199_v2 = vmul.f32 %v195_v1, %v361_v52 }
  0x57   :  { %v196_v3 = vsel %vm46_vm0, %v178_v62, %v194_v0 }
  0x58   :  { %v200_v4 = vmul.f32 %v196_v3, %v363_v53 }
  0x7a   :  { %v205_v7 = vpop.permute.xlu0 %204 }
  0x7b   :  { %v209_v9 = vperm.slane %v205_v7, %v208_v8 }
  0x7d   :  { %v211_v11 = vmul.f32 %v209_v9, %v199_v2  ;;  %v212_v12 = vmul.f32 %v209_v9, %v200_v4 }
  0x82   :  { %v217_v10 = vpop.permute.xlu0 %216 }
  0x83   :  { %v221_v13 = vperm.slane %v217_v10, %v208_v8 }
  0x85   :  { %v223_v52 = vadd.f32 %v221_v13, %v211_v11  ;;  %v224_v14 = vadd.f32 %v221_v13, %v212_v12 }
  0x87   :  { %225 = vst [vmem:[#allocation5] sm:$0xff] %v223_v52 }
  0x88   :  { %226 = vst [vmem:[#allocation5 + $0x8] sm:$0xff] %v224_v14 }
  0x89   :  { %239 = dma.vmem_to_hbm [thread:$0]  %s232_s2, 256, %s234_s24, [#allocation4], %s317_s17, %s317_s17, %s318_s18  }
  0x8a   :  { %314 = dma.done.wait [#allocation4], 256  }
  0x8b   :  { %315 = vsyncadd [#allocation4], 4294967040 }
  0x8c   :  { %244 = vsyncpa [#allocation3], 1 }
  0x8d   :  { %245 = vsyncpa [#allocation4], 1 }

</bundles_post_ra>
